<compile_context>
chip_gen: v7x
topology: tpu7x:2x2x1
jax: 0.10.0
libtpu: 0.0.40
codegen_flags: <defaults>
</compile_context>

<pallas_src>
import functools
import math

import jax
import jax.numpy as jnp
from jax import lax
from jax.experimental import pallas as pl
from jax.experimental.pallas import tpu as pltpu

_MIB = 1024 * 1024


def _cdiv(a, b):
    return -(-a // b)


def _round_up(n, m):
    return ((n + m - 1) // m) * m


def _sublane(dtype):
    # sublane packing: 8 rows for 4-byte, 16 for 2-byte, 32 for 1-byte dtypes
    return max(8, 32 // jnp.dtype(dtype).itemsize)


def _vmem_limit_bytes():
    """Generation-aware scoped-VMEM budget.

    v5e/v6e (128 MiB physical) -> 64 MiB limit; v7x (64 MiB physical) -> 32 MiB.
    """
    try:
        cap = int(pltpu.get_tpu_info().vmem_capacity_bytes)
    except Exception:
        cap = 64 * _MIB                      # conservative (v7x-sized) fallback
    return min(64 * _MIB, max(cap // 2, 16 * _MIB))


# ---------------------------------------------------------------------------
# in-kernel math
# ---------------------------------------------------------------------------

def _siglog_tanh(z, alpha):
    """tanh(alpha * siglog(z)), siglog(z) = sign(z) * log1p(|z|); z is f32."""
    if alpha == 1.0:
        # tanh is odd; tanh(log1p(u)) = (u^2+2u)/(u^2+2u+2) for u = |z| >= 0
        #   => tanh(siglog(z)) = z*(|z|+2) / (z^2 + 2|z| + 2)
        # -> no log1p / tanh; one EUP reciprocal + a Newton step (f32-accurate).
        a = jnp.abs(z)
        denom = z * z + 2.0 * a + 2.0        # >= 2, no hazards
        r = pl.reciprocal(denom, approx=True)
        r = r * (2.0 - denom * r)            # Newton refine: rel-err ~ eps^2
        return z * (a + 2.0) * r
    # general alpha: hoist sign out of tanh (tanh odd) -> single log1p + tanh
    a = jnp.abs(z)
    return jnp.sign(z) * jnp.tanh(alpha * jnp.log1p(a))


def _fused_train_kernel(mean_ref, std_ref, x_ref, o_ref, nmean_ref, nstd_ref,
                        *, alpha, ratio, inv_n, epsilon):
    """Single pass over one (tm, K) row-slab: stats + EMA + siglog/tanh apply."""
    x = x_ref[...].astype(jnp.float32)                     # f32 accumulation
    s = jnp.sum(x, axis=1, keepdims=True)
    s2 = jnp.sum(x * x, axis=1, keepdims=True)
    mean_axis = s * inv_n
    new_mean = (1.0 - ratio) * mean_ref[...] + ratio * mean_axis
    # E[(x-new_mean)^2] = E[x^2] - 2*new_mean*E[x] + new_mean^2, clamped >= 0
    # to guard one-pass-variance cancellation before sqrt.
    var_axis = jnp.maximum(
        s2 * inv_n - (2.0 * mean_axis - new_mean) * new_mean, 0.0)
    new_std = (1.0 - ratio) * std_ref[...] + ratio * var_axis
    nmean_ref[...] = new_mean
    nstd_ref[...] = new_std
    disc = 1.0 / (epsilon + jnp.sqrt(new_std))             # per-row: cheap, exact
    z = (x - new_mean) * disc
    o_ref[...] = _siglog_tanh(z, alpha).astype(o_ref.dtype)


def _apply_kernel(scale_ref, shift_ref, x_ref, o_ref, *, alpha):
    """z = (x - mean)*disc  ==  x*scale - shift  (scale=disc, shift=mean*disc)."""
    z = x_ref[...].astype(jnp.float32) * scale_ref[...] - shift_ref[...]
    o_ref[...] = _siglog_tanh(z, alpha).astype(o_ref.dtype)


def _stats_kernel(x_ref, sum_ref, sq_ref, acc_s, acc_q, *, K, tk):
    """Fallback pass 1: row sum / sum-sq with a VALU (tm,128) accumulator."""
    k = pl.program_id(1)

    @pl.when(k == 0)
    def _init():
        acc_s[...] = jnp.zeros_like(acc_s)
        acc_q[...] = jnp.zeros_like(acc_q)

    x = x_ref[...].astype(jnp.float32)
    if K % tk != 0:
        # mask the ragged last K tile in-kernel (no HBM padding pass)
        col = k * tk + lax.broadcasted_iota(jnp.int32, x.shape, 1)
        x = jnp.where(col < K, x, 0.0)

    # accumulate 128-lane chunks with plain VALU adds; the XLU cross-lane
    # reduce + (tm,1) store happen only once, on the last K step.
    n_full = tk // 128
    for j in range(n_full):
        c = x[:, j * 128:(j + 1) * 128]
        acc_s[...] += c
        acc_q[...] += c * c
    rem = tk - n_full * 128                 # only possible when tk == K
    if rem:
        c = x[:, n_full * 128:tk]
        acc_s[:, :rem] = acc_s[:, :rem] + c
        acc_q[:, :rem] = acc_q[:, :rem] + c * c

    @pl.when(k == pl.num_programs(1) - 1)
    def _fin():
        sum_ref[...] = jnp.sum(acc_s[...], axis=1, keepdims=True)
        sq_ref[...] = jnp.sum(acc_q[...], axis=1, keepdims=True)


# ---------------------------------------------------------------------------
# pallas_call wrappers
# ---------------------------------------------------------------------------

def _fused_train_call(x2d, mean2d, std2d, *, tm, alpha, ratio, epsilon,
                      vmem_limit):
    M, K = x2d.shape
    in_b = jnp.dtype(x2d.dtype).itemsize
    kern = functools.partial(_fused_train_kernel, alpha=float(alpha),
                             ratio=float(ratio), inv_n=1.0 / float(K),
                             epsilon=float(epsilon))
    return pl.pallas_call(
        kern,
        out_shape=(jax.ShapeDtypeStruct((M, K), x2d.dtype),
                   jax.ShapeDtypeStruct((M, 1), jnp.float32),
                   jax.ShapeDtypeStruct((M, 1), jnp.float32)),
        grid_spec=pltpu.PrefetchScalarGridSpec(
            num_scalar_prefetch=0,
            grid=(_cdiv(M, tm),),
            in_specs=[pl.BlockSpec((tm, 1), lambda i: (i, 0)),
                      pl.BlockSpec((tm, 1), lambda i: (i, 0)),
                      pl.BlockSpec((tm, K), lambda i: (i, 0))],
            out_specs=(pl.BlockSpec((tm, K), lambda i: (i, 0)),
                       pl.BlockSpec((tm, 1), lambda i: (i, 0)),
                       pl.BlockSpec((tm, 1), lambda i: (i, 0))),
        ),
        compiler_params=pltpu.CompilerParams(
            dimension_semantics=("parallel",),
            vmem_limit_bytes=int(vmem_limit)),
        cost_estimate=pl.CostEstimate(
            flops=int(14 * M * K),
            transcendentals=int((1 if alpha == 1.0 else 2) * M * K),
            bytes_accessed=int(2 * M * K * in_b + 6 * M * 4)),
    )(mean2d, std2d, x2d)


def _apply_call(x2d, scale2d, shift2d, *, tm, tk, alpha, vmem_limit):
    M, K = x2d.shape
    in_b = jnp.dtype(x2d.dtype).itemsize
    kern = functools.partial(_apply_kernel, alpha=float(alpha))
    return pl.pallas_call(
        kern,
        out_shape=jax.ShapeDtypeStruct((M, K), x2d.dtype),
        grid_spec=pltpu.PrefetchScalarGridSpec(
            num_scalar_prefetch=0,
            grid=(_cdiv(M, tm), _cdiv(K, tk)),
            in_specs=[pl.BlockSpec((tm, 1), lambda i, k: (i, 0)),
                      pl.BlockSpec((tm, 1), lambda i, k: (i, 0)),
                      pl.BlockSpec((tm, tk), lambda i, k: (i, k))],
            out_specs=pl.BlockSpec((tm, tk), lambda i, k: (i, k)),
        ),
        compiler_params=pltpu.CompilerParams(
            dimension_semantics=("parallel", "parallel"),
            vmem_limit_bytes=int(vmem_limit)),
        cost_estimate=pl.CostEstimate(
            flops=int(10 * M * K),
            transcendentals=int((1 if alpha == 1.0 else 2) * M * K),
            bytes_accessed=int(2 * M * K * in_b)),
    )(scale2d, shift2d, x2d)


def _stats_call(x2d, *, tm, tk, vmem_limit):
    M, K = x2d.shape
    in_b = jnp.dtype(x2d.dtype).itemsize
    kern = functools.partial(_stats_kernel, K=K, tk=tk)
    return pl.pallas_call(
        kern,
        out_shape=(jax.ShapeDtypeStruct((M, 1), jnp.float32),
                   jax.ShapeDtypeStruct((M, 1), jnp.float32)),
        grid_spec=pltpu.PrefetchScalarGridSpec(
            num_scalar_prefetch=0,
            grid=(_cdiv(M, tm), _cdiv(K, tk)),
            in_specs=[pl.BlockSpec((tm, tk), lambda i, k: (i, k))],
            out_specs=(pl.BlockSpec((tm, 1), lambda i, k: (i, 0)),
                       pl.BlockSpec((tm, 1), lambda i, k: (i, 0))),
            scratch_shapes=[pltpu.VMEM((tm, 128), jnp.float32),
                            pltpu.VMEM((tm, 128), jnp.float32)],
        ),
        compiler_params=pltpu.CompilerParams(
            dimension_semantics=("parallel", "arbitrary"),
            vmem_limit_bytes=int(vmem_limit)),
        cost_estimate=pl.CostEstimate(
            flops=int(3 * M * K),
            transcendentals=0,
            bytes_accessed=int(M * K * in_b + 2 * M * 4)),
    )(x2d)


# ---------------------------------------------------------------------------
# tile planners (generation-aware, never collapse the lane dim)
# ---------------------------------------------------------------------------

def _plan_fused_rows(M, K, in_b, out_b, vmem_limit, sub):
    """Rows per block for the single-pass (tm, K) row-slab kernel.

    Returns None if even a minimal row slab does not fit the VMEM budget.
    """
    # double-buffered in/out blocks + ~4 live f32 temporaries per element
    per_row = K * (2 * in_b + 2 * out_b + 4 * 4) + 64
    budget = int(vmem_limit * 0.7)
    if per_row * min(sub, M) > budget:
        return None
    tm = min(M, max(budget // per_row, 1))
    if tm < M:
        tm = max((tm // sub) * sub, sub)
    elif M > sub:
        # prefer >= 2 row tiles so both v7x TensorCores get a share of the grid
        tm = max(_round_up(_cdiv(M, 2), sub), sub)
    return tm


def _plan_tiled(M, K, in_b, out_b, vmem_limit, sub):
    """(tm, tk) for the two-pass fallback / standalone apply.

    Never collapses the lane dim toward 128 (measured: 128-wide tiles reach
    ~29% of HBM roofline vs ~85% at 512+); sheds rows first.
    """
    budget = int(vmem_limit * 0.6)
    per_elem = 2 * in_b + 2 * out_b + 4 * 4
    tm = min(M, 256)
    if M > sub:                              # keep >=2 row tiles (v7x megacore)
        tm = min(tm, max(_round_up(_cdiv(M, 2), sub), sub))
    if tm < M:
        tm = max((tm // sub) * sub, sub)

    def lanes_for(rows):
        return max(((budget // (rows * per_elem)) // 128) * 128, 128)

    tk = lanes_for(tm)
    while tk < 512 and tm > sub:
        tm = max(((tm // 2) // sub) * sub, sub)
        tk = lanes_for(tm)
    if tk >= K:
        tk = K                               # full-dim K block: always legal
    return tm, tk


# ---------------------------------------------------------------------------
# functional forward
# ---------------------------------------------------------------------------

def tanh_siglog_znorm_forward(x, mean, std, beta_power, *, axis, beta=1e-6,
                              epsilon=1e-12, alpha=1.0, training=True,
                              _force_two_pass=False, _force_tiles=None):
    """Forward of TanhSiglogZNormalizer (per-axis branch).

    mean/std: running buffers shaped like param_shape (size == prod kept dims).
    std stores an EMA of the *variance* (matching the PyTorch reference).
    beta_power: host Python float (torch keeps it in float64).
    Returns (out, new_mean, new_std, new_beta_power).
    """
    ndim = x.ndim
    axis_seq = axis if isinstance(axis, (tuple, list)) else (axis,)
    axis_t = tuple(sorted(a % ndim for a in axis_seq))
    kept = tuple(a for a in range(ndim) if a not in axis_t)
    perm = kept + axis_t
    kept_shape = tuple(x.shape[a] for a in kept)
    red_shape = tuple(x.shape[a] for a in axis_t)
    M = math.prod(kept_shape) if kept_shape else 1
    K = math.prod(red_shape) if red_shape else 1
    assert mean.size == M and std.size == M, "buffers must match param_shape"
    # TODO(synk): the scalar whole-tensor branch (output_shape == 1) and the
    # `idx` sub-batch selection of ZNormalizer.forward are not implemented.

    if perm != tuple(range(ndim)):
        # TODO(synk): fold non-trailing reduced axes into the BlockSpec
        # index_map instead of paying an HBM transpose here.
        xt = jnp.transpose(x, perm)
    else:
        xt = x           # e.g. NCHW + axis=(2,3): identity perm, reshape free
    x2d = xt.reshape(M, K)

    sub = _sublane(x.dtype)
    in_b = jnp.dtype(x.dtype).itemsize
    out_b = in_b
    vmem_limit = _vmem_limit_bytes()

    mean2d = mean.astype(jnp.float32).reshape(M, 1)
    std2d = std.astype(jnp.float32).reshape(M, 1)

    if training:
        new_bp = float(beta_power) * (1.0 - beta)
        ratio = float(beta / max(1.0 - new_bp, beta))
        tm_fused = None if _force_two_pass else _plan_fused_rows(
            M, K, in_b, out_b, vmem_limit, sub)
        if tm_fused is not None:
            # single pass over x: stats + EMA/var/disc + siglog/tanh apply
            out2d, new_mean2d, new_std2d = _fused_train_call(
                x2d, mean2d, std2d, tm=tm_fused, alpha=alpha, ratio=ratio,
                epsilon=epsilon, vmem_limit=vmem_limit)
        else:
            # fallback (row slab too big for VMEM): tiled stats + tiled apply
            tm, tk = _force_tiles or _plan_tiled(M, K, in_b, out_b,
                                                 vmem_limit, sub)
            row_sum, row_sq = _stats_call(x2d, tm=tm, tk=tk,
                                          vmem_limit=vmem_limit)
            inv_n = 1.0 / float(K)
            mean_axis = row_sum * inv_n
            new_mean2d = (1.0 - ratio) * mean2d + ratio * mean_axis
            var_axis = jnp.maximum(
                row_sq * inv_n - (2.0 * mean_axis - new_mean2d) * new_mean2d,
                0.0)
            new_std2d = (1.0 - ratio) * std2d + ratio * var_axis
            scale = 1.0 / (epsilon + jnp.sqrt(new_std2d))
            shift = new_mean2d * scale
            out2d = _apply_call(x2d, scale, shift, tm=tm, tk=tk, alpha=alpha,
                                vmem_limit=vmem_limit)
    else:
        new_bp = float(beta_power)
        new_mean2d, new_std2d = mean2d, std2d
        scale = 1.0 / (epsilon + jnp.sqrt(std2d))
        shift = mean2d * scale
        tm, tk = _force_tiles or _plan_tiled(M, K, in_b, out_b, vmem_limit, sub)
        out2d = _apply_call(x2d, scale, shift, tm=tm, tk=tk, alpha=alpha,
                            vmem_limit=vmem_limit)

    # NOTE: BackPropControlFunction is identity in the forward pass (no-op).
    out = out2d.reshape(kept_shape + red_shape)
    if perm != tuple(range(ndim)):
        inv_perm = [0] * ndim
        for i, p in enumerate(perm):
            inv_perm[p] = i
        out = jnp.transpose(out, tuple(inv_perm))

    new_mean = new_mean2d.reshape(mean.shape).astype(mean.dtype)
    new_std = new_std2d.reshape(std.shape).astype(std.dtype)
    return out, new_mean, new_std, new_bp


# ---------------------------------------------------------------------------
# self-test
# ---------------------------------------------------------------------------

if __name__ == "__main__":
    beta, epsilon = 1e-6, 1e-12

    def reference(x, mean0, std0, bp0, axis, alpha, training):
        """Pure-JAX replica of the PyTorch forward."""
        if training:
            bp = bp0 * (1.0 - beta)
            ratio = beta / max(1.0 - bp, beta)
            oshape = tuple(1 if i in axis else s for i, s in enumerate(x.shape))
            mean_axis = x.mean(axis=axis).reshape(oshape)
            new_mean = (1.0 - ratio) * mean0 + ratio * mean_axis
            var_axis = ((x - new_mean) ** 2).mean(axis=axis).reshape(oshape)
            new_std = (1.0 - ratio) * std0 + ratio * var_axis
        else:
            bp, new_mean, new_std = bp0, mean0, std0
        disc = 1.0 / (epsilon + jnp.sqrt(new_std))
        z = (x - new_mean) * disc
        out = jnp.tanh(alpha * (jnp.sign(z) * jnp.log1p(jnp.abs(z))))
        return out, new_mean, new_std, bp

    # ---- case 1: NCHW, axis=(2,3), alpha=1 (transcendental-free fast path) --
    B, C, H, W = 2, 4, 16, 16
    x = jax.random.normal(jax.random.PRNGKey(0), (B, C, H, W), jnp.float32)
    axis = (2, 3)
    mean0 = jnp.zeros((B, C, 1, 1), jnp.float32)
    std0 = jnp.ones((B, C, 1, 1), jnp.float32)

    out, nm, ns, nbp = tanh_siglog_znorm_forward(
        x, mean0, std0, 1.0, axis=axis, beta=beta, epsilon=epsilon,
        alpha=1.0, training=True)
    out = jax.block_until_ready(out)
    r_out, r_m, r_s, r_bp = reference(x, mean0, std0, 1.0, axis, 1.0, True)
    assert out.shape == r_out.shape, (out.shape, r_out.shape)
    assert jnp.allclose(out, r_out, atol=1e-4, rtol=1e-4), \
        float(jnp.max(jnp.abs(out - r_out)))
    assert jnp.allclose(nm, r_m, atol=1e-5, rtol=1e-5)
    assert jnp.allclose(ns, r_s, atol=1e-4, rtol=1e-4)
    assert abs(nbp - r_bp) < 1e-12

    # eval mode (apply-only path, precombined scale/shift)
    out_e, _, _, _ = tanh_siglog_znorm_forward(
        x, nm, ns, nbp, axis=axis, beta=beta, epsilon=epsilon,
        alpha=1.0, training=False)
    out_e = jax.block_until_ready(out_e)
    r_out_e, _, _, _ = reference(x, nm, ns, nbp, axis, 1.0, False)
    assert jnp.allclose(out_e, r_out_e, atol=1e-4, rtol=1e-4)

    # forced two-pass fallback (tiled VALU-accumulated stats + tiled apply)
    out_f, nm_f, ns_f, _ = tanh_siglog_znorm_forward(
        x, mean0, std0, 1.0, axis=axis, beta=beta, epsilon=epsilon,
        alpha=1.0, training=True, _force_two_pass=True, _force_tiles=(8, 128))
    out_f = jax.block_until_ready(out_f)
    assert jnp.allclose(out_f, r_out, atol=1e-4, rtol=1e-4)
    assert jnp.allclose(nm_f, r_m, atol=1e-5, rtol=1e-5)
    assert jnp.allclose(ns_f, r_s, atol=1e-4, rtol=1e-4)

    # ---- case 2: ragged shapes (no padding anywhere) + alpha != 1 path ------
    x2 = jax.random.normal(jax.random.PRNGKey(1), (2, 3, 5, 7), jnp.float32)
    mean2 = jnp.zeros((2, 3, 1, 1), jnp.float32)
    std2 = jnp.ones((2, 3, 1, 1), jnp.float32)
    out2, nm2, ns2, _ = tanh_siglog_znorm_forward(
        x2, mean2, std2, 1.0, axis=axis, beta=beta, epsilon=epsilon,
        alpha=0.5, training=True)
    out2 = jax.block_until_ready(out2)
    r2_out, r2_m, r2_s, _ = reference(x2, mean2, std2, 1.0, axis, 0.5, True)
    assert jnp.allclose(out2, r2_out, atol=1e-4, rtol=1e-4)
    assert jnp.allclose(nm2, r2_m, atol=1e-5, rtol=1e-5)
    assert jnp.allclose(ns2, r2_s, atol=1e-4, rtol=1e-4)

    print("KERNEL_OK")
</pallas_src>

<mosaic_0001>
module attributes {stable_mosaic.version = 11 : i64} {
  func.func @_fused_train_kernel(%arg0: i32, %arg1: memref<8x1xf32, #tpu.memory_space<vmem>>, %arg2: memref<8x1xf32, #tpu.memory_space<vmem>>, %arg3: memref<8x256xf32, #tpu.memory_space<vmem>>, %arg4: memref<8x256xf32, #tpu.memory_space<vmem>>, %arg5: memref<8x1xf32, #tpu.memory_space<vmem>>, %arg6: memref<8x1xf32, #tpu.memory_space<vmem>>) attributes {dimension_semantics = [#tpu.dimension_semantics<parallel>], iteration_bounds = array<i64: 1>, scalar_prefetch = 0 : i64, scratch_operands = 0 : i64, tpu.core_type = #tpu.core_type<tc>, window_params = [{transform_indices = @transform_0, window_bounds = array<i64: 8, 1>}, {transform_indices = @transform_1, window_bounds = array<i64: 8, 1>}, {transform_indices = @transform_2, window_bounds = array<i64: 8, 256>}, {transform_indices = @transform_3, window_bounds = array<i64: 8, 256>}, {transform_indices = @transform_4, window_bounds = array<i64: 8, 1>}, {transform_indices = @transform_5, window_bounds = array<i64: 8, 1>}]} {
    %c0 = arith.constant 0 : index
    %c0_0 = arith.constant 0 : index
    %0 = vector.load %arg3[%c0, %c0_0] : memref<8x256xf32, #tpu.memory_space<vmem>>, vector<8x256xf32>
    %cst = arith.constant dense<0.000000e+00> : vector<8xf32>
    %1 = vector.multi_reduction <add>, %0, %cst [1] : vector<8x256xf32> to vector<8xf32>
    %2 = vector.shape_cast %1 : vector<8xf32> to vector<8x1xf32>
    %3 = arith.mulf %0, %0 : vector<8x256xf32>
    %cst_1 = arith.constant dense<0.000000e+00> : vector<8xf32>
    %4 = vector.multi_reduction <add>, %3, %cst_1 [1] : vector<8x256xf32> to vector<8xf32>
    %5 = vector.shape_cast %4 : vector<8xf32> to vector<8x1xf32>
    %cst_2 = arith.constant 3.906250e-03 : f32
    %6 = vector.broadcast %cst_2 : f32 to vector<8x1xf32>
    %7 = arith.mulf %2, %6 : vector<8x1xf32>
    %c0_3 = arith.constant 0 : index
    %c0_4 = arith.constant 0 : index
    %8 = vector.load %arg1[%c0_3, %c0_4] : memref<8x1xf32, #tpu.memory_space<vmem>>, vector<8x1xf32>
    %cst_5 = arith.constant 2.87556645E-11 : f32
    %9 = vector.broadcast %cst_5 : f32 to vector<8x1xf32>
    %10 = arith.mulf %9, %8 : vector<8x1xf32>
    %cst_6 = arith.constant 1.000000e+00 : f32
    %11 = vector.broadcast %cst_6 : f32 to vector<8x1xf32>
    %12 = arith.mulf %11, %7 : vector<8x1xf32>
    %13 = arith.addf %10, %12 : vector<8x1xf32>
    %cst_7 = arith.constant 3.906250e-03 : f32
    %14 = vector.broadcast %cst_7 : f32 to vector<8x1xf32>
    %15 = arith.mulf %5, %14 : vector<8x1xf32>
    %cst_8 = arith.constant 2.000000e+00 : f32
    %16 = vector.broadcast %cst_8 : f32 to vector<8x1xf32>
    %17 = arith.mulf %16, %7 : vector<8x1xf32>
    %18 = arith.subf %17, %13 : vector<8x1xf32>
    %19 = arith.mulf %18, %13 : vector<8x1xf32>
    %20 = arith.subf %15, %19 : vector<8x1xf32>
    %cst_9 = arith.constant 0.000000e+00 : f32
    %21 = vector.broadcast %cst_9 : f32 to vector<8x1xf32>
    %22 = arith.maximumf %20, %21 : vector<8x1xf32>
    %c0_10 = arith.constant 0 : index
    %c0_11 = arith.constant 0 : index
    %23 = vector.load %arg2[%c0_10, %c0_11] : memref<8x1xf32, #tpu.memory_space<vmem>>, vector<8x1xf32>
    %cst_12 = arith.constant 2.87556645E-11 : f32
    %24 = vector.broadcast %cst_12 : f32 to vector<8x1xf32>
    %25 = arith.mulf %24, %23 : vector<8x1xf32>
    %cst_13 = arith.constant 1.000000e+00 : f32
    %26 = vector.broadcast %cst_13 : f32 to vector<8x1xf32>
    %27 = arith.mulf %26, %22 : vector<8x1xf32>
    %28 = arith.addf %25, %27 : vector<8x1xf32>
    %c0_14 = arith.constant 0 : index
    %c0_15 = arith.constant 0 : index
    %29 = vector.load %arg5[%c0_14, %c0_15] : memref<8x1xf32, #tpu.memory_space<vmem>>, vector<8x1xf32>
    tpu.vector_store %arg5[%c0_14, %c0_15], %13 {strides = array<i32>} : memref<8x1xf32, #tpu.memory_space<vmem>>, vector<8x1xf32>,
    %c0_16 = arith.constant 0 : index
    %c0_17 = arith.constant 0 : index
    %30 = vector.load %arg6[%c0_16, %c0_17] : memref<8x1xf32, #tpu.memory_space<vmem>>, vector<8x1xf32>
    tpu.vector_store %arg6[%c0_16, %c0_17], %28 {strides = array<i32>} : memref<8x1xf32, #tpu.memory_space<vmem>>, vector<8x1xf32>,
    %31 = math.sqrt %28 : vector<8x1xf32>
    %cst_18 = arith.constant 9.99999996E-13 : f32
    %32 = vector.broadcast %cst_18 : f32 to vector<8x1xf32>
    %33 = arith.addf %32, %31 : vector<8x1xf32>
    %cst_19 = arith.constant 1.000000e+00 : f32
    %34 = vector.broadcast %cst_19 : f32 to vector<8x1xf32>
    %35 = arith.divf %34, %33 : vector<8x1xf32>
    %36 = vector.broadcast %13 : vector<8x1xf32> to vector<8x256xf32>
    %37 = arith.subf %0, %36 : vector<8x256xf32>
    %38 = vector.broadcast %35 : vector<8x1xf32> to vector<8x256xf32>
    %39 = arith.mulf %37, %38 : vector<8x256xf32>
    %40 = math.absf %39 : vector<8x256xf32>
    %41 = arith.mulf %39, %39 : vector<8x256xf32>
    %cst_20 = arith.constant 2.000000e+00 : f32
    %42 = vector.broadcast %cst_20 : f32 to vector<8x256xf32>
    %43 = arith.mulf %42, %40 : vector<8x256xf32>
    %44 = arith.addf %41, %43 : vector<8x256xf32>
    %cst_21 = arith.constant 2.000000e+00 : f32
    %45 = vector.broadcast %cst_21 : f32 to vector<8x256xf32>
    %46 = arith.addf %44, %45 : vector<8x256xf32>
    %47 = tpu.reciprocal %46 {approx = true} : vector<8x256xf32> -> vector<8x256xf32>
    %48 = arith.mulf %46, %47 : vector<8x256xf32>
    %cst_22 = arith.constant 2.000000e+00 : f32
    %49 = vector.broadcast %cst_22 : f32 to vector<8x256xf32>
    %50 = arith.subf %49, %48 : vector<8x256xf32>
    %51 = arith.mulf %47, %50 : vector<8x256xf32>
    %cst_23 = arith.constant 2.000000e+00 : f32
    %52 = vector.broadcast %cst_23 : f32 to vector<8x256xf32>
    %53 = arith.addf %40, %52 : vector<8x256xf32>
    %54 = arith.mulf %39, %53 : vector<8x256xf32>
    %55 = arith.mulf %54, %51 : vector<8x256xf32>
    %c0_24 = arith.constant 0 : index
    %c0_25 = arith.constant 0 : index
    %56 = vector.load %arg4[%c0_24, %c0_25] : memref<8x256xf32, #tpu.memory_space<vmem>>, vector<8x256xf32>
    tpu.vector_store %arg4[%c0_24, %c0_25], %55 {strides = array<i32>} : memref<8x256xf32, #tpu.memory_space<vmem>>, vector<8x256xf32>,
    return
  }
  func.func @transform_0(%arg0: i32) -> (i32, i32) {
    %c0_i32 = arith.constant 0 : i32
    %c0_i32_0 = arith.constant 0 : i32
    return %arg0, %c0_i32 : i32, i32
  }
  func.func @transform_1(%arg0: i32) -> (i32, i32) {
    %c0_i32 = arith.constant 0 : i32
    %c0_i32_0 = arith.constant 0 : i32
    return %arg0, %c0_i32 : i32, i32
  }
  func.func @transform_2(%arg0: i32) -> (i32, i32) {
    %c0_i32 = arith.constant 0 : i32
    %c0_i32_0 = arith.constant 0 : i32
    return %arg0, %c0_i32 : i32, i32
  }
  func.func @transform_3(%arg0: i32) -> (i32, i32) {
    %c0_i32 = arith.constant 0 : i32
    %c0_i32_0 = arith.constant 0 : i32
    return %arg0, %c0_i32 : i32, i32
  }
  func.func @transform_4(%arg0: i32) -> (i32, i32) {
    %c0_i32 = arith.constant 0 : i32
    %c0_i32_0 = arith.constant 0 : i32
    return %arg0, %c0_i32 : i32, i32
  }
  func.func @transform_5(%arg0: i32) -> (i32, i32) {
    %c0_i32 = arith.constant 0 : i32
    %c0_i32_0 = arith.constant 0 : i32
    return %arg0, %c0_i32 : i32, i32
  }
}

</mosaic_0001>

<bundles_post_ra>
// kernel: tpu_custom_call.1
= control target key start
LH: loop header
LB: loop body
LE: loop exit
PB: predicated region body
PF: predicated region fallthrough
CT: control target
= control target key end

     0   :  { %s214_s0 = inlined_call_operand.vmem [shape: f32[8,1], index: 0, kind: input, shape index: {}]   ;;  %s215_s1 = inlined_call_operand.vmem [shape: f32[8,1], index: 1, kind: input, shape index: {}]   ;;  %s216_s2 = inlined_call_operand.vmem [shape: f32[8,256], index: 2, kind: input, shape index: {}]   ;;  %s217_s3 = inlined_call_operand.hbm [shape: f32[8,256], index: 3, kind: output, shape index: {0}]   ;;  %s218_s4 = inlined_call_operand.vmem [shape: f32[8,1], index: 4, kind: output, shape index: {1}]   ;;  %s219_s5 = inlined_call_operand.vmem [shape: f32[8,1], index: 5, kind: output, shape index: {2}]  }
   0x1   :  { %v18_v0 = vld [vmem:[%s216_s2] sm:$0xff]  ;;  %v19_v1 = vld [vmem:[%s216_s2 + $0x8] sm:$0xff] }
   0x2   :  { %v20_v2 = vadd.f32 %v19_v1, %v18_v0  ;;  %v23_v3 = vmul.f32 %v18_v0, %v18_v0  ;;  %v24_v4 = vmul.f32 %v19_v1, %v19_v1 }
   0x3   :  { %11 = vsyncpa [#allocation3], 0  ;;  %v152_v6 = vmov 0   ;;  %v29_v7 = vld [vmem:[%s214_s0] sm:$0xff]  ;;  %vm41_vm0 = vcmask 7168  }
   0x4   :  { %21 = vadd.xlane.f32.xlu0 %v20_v2  ;;  %v25_v5 = vadd.f32 %v24_v4, %v23_v3  ;;  %118 = vset.pattern.permute.xlu1 %v152_v6  ;;  %v30_v8 = vmul.f32 2.8755665e-11, %v29_v7  ;;  %v38_v16 = vld [vmem:[%s215_s1] sm:$0xff]  ;;  %s153_s1 = smov [#allocation2]  }
   0x5   :  { %119 = vset.pattern.permute.xlu0 %v152_v6  ;;  %v39_v18 = vmul.f32 2.8755665e-11, %v38_v16 }
   0x8   :  { %26 = vadd.xlane.f32.xlu0 %v25_v5 }
  0x91   :  { %v22_v9 = vpop.xlane.xlu0 %21 }
  0x92   :  { %v28_v10 = vmul.f32 0.00390625, %v22_v9 }
  0x94   :  { %v31_v11 = vadd.f32 %v30_v8, %v28_v10  ;;  %v33_v12 = vmul.f32 2.0, %v28_v10 }
  0x95   :  { %v27_v13 = vpop.xlane.xlu0 %26 }
  0x96   :  { %v34_v14 = vsub.f32 %v33_v12, %v31_v11  ;;  %42 = vst.msk [vmem:[%s218_s4] sm:$0xff] %vm41_vm0, %v31_v11  ;;  %56 = vperm.xlu1 %118, %v31_v11   ;;  %v32_v15 = vmul.f32 0.00390625, %v27_v13  ;;  %s100_s4 = sshll.u32 %s153_s1, 4  ;;  %s101_s4 = int_to_ptr.vmem [resolvable:$true] %s100_s4 }
  0x97   :  { %p133_p1 = scmp.lt.s32.totalorder %s101_s4, %s101_s4 }
  0x98   :  { %v35_v17 = vmul.f32 %v34_v14, %v31_v11 }
  0x9a   :  { %v36_v19 = vsub.f32 %v32_v15, %v35_v17 }
  0x9c   :  { %v37_v20 = vmax.f32 %v36_v19, 0.0 }
  0x9e   :  { %v40_v21 = vadd.f32 %v39_v18, %v37_v20 }
  0xa0   :  { %43 = vst.msk [vmem:[%s219_s5] sm:$0xff] %vm41_vm0, %v40_v21  ;;  %120 = vrsqrt.f32 %v40_v21  ;;  %vm46_vm1 = vcmp.eq.f32.partialorder %v40_v21, inf  ;;  %v49_v24 = vand.u32 2147483648, %v40_v21  ;;  %vm48_vm2 = vcmp.eq.f32.partialorder %v40_v21, 0.0  ;;  %s128_s5 = scalar_lea.vmem %s101_s4, 256 }
  0xa1   :  { %p129_p0 = scmp.ne.s32.totalorder %s101_s4, %s128_s5  ;;  %p134_p2 = scmp.lt.s32.totalorder %s128_s5, %s128_s5 }
  0xa3   :  { %p135_p3 = por %p134_p2, %p133_p1 }
  0xa5   :  { %p136_p4 = pnand %p135_p3, %p129_p0 }
  0xaa   :  { %v121_v22 = vpop.eup %120 }
  0xab   :  { %v45_v23 = vmul.f32 %v121_v22, %v40_v21 }
  0xad   :  { %v47_v25 = vsel %vm46_vm1, %v40_v21, %v45_v23 }
  0xae   :  { %v50_v26 = vsel %vm48_vm2, %v49_v24, %v47_v25 }
  0xaf   :  { %v51_v27 = vadd.f32 1e-12, %v50_v26 }
  0xb1   :  { %122 = vrcp.f32 %v51_v27 }
  0xbb   :  { %v123_v28 = vpop.eup %122 }
  0xbc   :  { %63 = vperm.xlu1 %118, %v123_v28  }
 0x115   :  { %v57_v29 = vpop.permute.xlu1 %56 }
 0x116   :  { %v59_v30 = vsub.f32 %v18_v0, %v57_v29  ;;  %v60_v31 = vsub.f32 %v19_v1, %v57_v29 }
 0x13b   :  { %v64_v32 = vpop.permute.xlu1 %63 }
 0x13c   :  { %v66_v33 = vmul.f32 %v64_v32, %v59_v30  ;;  %v67_v34 = vmul.f32 %v64_v32, %v60_v31 }
 0x13e   :  { %v68_v35 = vand.u32 2147483647, %v66_v33  ;;  %v69_v36 = vand.u32 2147483647, %v67_v34  ;;  %v70_v37 = vmul.f32 %v66_v33, %v66_v33  ;;  %v71_v38 = vmul.f32 %v67_v34, %v67_v34 }
 0x140   :  { %v72_v39 = vmul.f32 2.0, %v68_v35  ;;  %v73_v40 = vmul.f32 2.0, %v69_v36  ;;  %v86_v47 = vadd.f32 2.0, %v68_v35  ;;  %v87_v49 = vadd.f32 2.0, %v69_v36 }
 0x142   :  { %v74_v41 = vadd.f32 %v72_v39, %v70_v37  ;;  %v75_v42 = vadd.f32 %v73_v40, %v71_v38  ;;  %v88_v53 = vmul.f32 %v86_v47, %v66_v33  ;;  %v89_v55 = vmul.f32 %v87_v49, %v67_v34 }
 0x144   :  { %v76_v43 = vadd.f32 2.0, %v74_v41  ;;  %v77_v44 = vadd.f32 2.0, %v75_v42 }
 0x146   :  { %124 = vrcp.f32 %v76_v43 }
 0x147   :  { %126 = vrcp.f32 %v77_v44 }
 0x150   :  { %v125_v45 = vpop.eup %124 }
 0x151   :  { %v127_v46 = vpop.eup %126  ;;  %v80_v48 = vmul.f32 %v125_v45, %v76_v43 }
 0x152   :  { %v81_v50 = vmul.f32 %v127_v46, %v77_v44 }
 0x153   :  { %v82_v51 = vsub.f32 2.0, %v80_v48 }
 0x154   :  { %v83_v52 = vsub.f32 2.0, %v81_v50 }
 0x155   :  { %v84_v54 = vmul.f32 %v125_v45, %v82_v51 }
 0x156   :  { %v85_v56 = vmul.f32 %v127_v46, %v83_v52 }
 0x157   :  { %v90_v57 = vmul.f32 %v88_v53, %v84_v54 }
 0x158   :  { %v91_v58 = vmul.f32 %v89_v55, %v85_v56 }
 0x159   :  { %92 = vst [vmem:[#allocation2] sm:$0xff] %v90_v57 }
 0x15a   :  { %93 = vst [vmem:[#allocation2 + $0x8] sm:$0xff] %v91_v58 }
 0x15b   :  { %139 = shalt.err (!%p136_p4)
}
 0x15c   :  { %s140_s30 = scalar_lea.hbm %s217_s3, 256 }
 0x15d   :  { %p141_p5 = scmp.ne.s32.totalorder %s217_s3, %s140_s30  ;;  %p144_p6 = scmp.lt.u32.totalorder %s140_s30, %s217_s3 }
 0x15f   :  { %p146_p7 = pnand %p144_p6, %p141_p5 }
 0x161   :  { %149 = shalt.err (!%p146_p7)
}
 0x162   :  { %103 = dma.vmem_to_hbm [thread:$0]  %s101_s4, 256, %s217_s3, [#allocation3]  }
 0x163   :  { %150 = dma.done.wait [#allocation3], 256  }
 0x164   :  { %151 = vsyncadd [#allocation3], 4294967040 }
 0x165   :  { %115 = vsyncpa [#allocation3], 1 }

</bundles_post_ra>
